<compile_context>
chip_gen: v6e
topology: v6e:2x2x1
jax: 0.10.0
libtpu: 0.0.40
codegen_flags: <defaults>
</compile_context>

<pallas_src>
import jax
import jax.numpy as jnp
from jax.experimental import pallas as pl
from jax.experimental.pallas import tpu as pltpu


def _vmem_limit_bytes():
    # ~3/4 of physical VMEM: ~96 MiB on v5e/v6e (128 MiB), ~48 MiB on v7x (64 MiB).
    try:
        return int(pltpu.get_tpu_info().vmem_capacity_bytes * 3 // 4)
    except Exception:
        return 64 * 1024 * 1024


def _round_up(n, m):
    return -(-n // m) * m


# --------------------------------------------------------------------------
# Weight-dropout mask (torch.nn.functional.dropout semantics, inverted dropout)
# --------------------------------------------------------------------------
def make_weight_dropout_mask(key, shape, p, training, variational):
    """Scaled keep-mask (values 0 or 1/(1-p)), f32, in the raw (4H, H) orientation."""
    rows, _ = shape
    if variational:
        # WeightDrop variational path: per-row mask, dropout ALWAYS applied.
        if p <= 0.0:
            return jnp.ones(shape, jnp.float32)
        if p >= 1.0:
            return jnp.zeros(shape, jnp.float32)
        keep = jax.random.bernoulli(key, 1.0 - p, (rows, 1))
        return jnp.broadcast_to(keep.astype(jnp.float32) / (1.0 - p), shape)
    if (not training) or p <= 0.0:
        return jnp.ones(shape, jnp.float32)
    if p >= 1.0:  # torch.dropout(p=1) zeroes everything
        return jnp.zeros(shape, jnp.float32)
    keep = jax.random.bernoulli(key, 1.0 - p, shape)
    return keep.astype(jnp.float32) / (1.0 - p)


# --------------------------------------------------------------------------
# Fused kernel: per grid step (one block of tb timesteps)
#   1. gates_x for the whole block: one (tb*B, I) x (I, 4H) bf16 MXU matmul + bias
#   2. serial recurrence over the tb steps, f32 state in VMEM scratch
# --------------------------------------------------------------------------
def _make_wd_lstm_kernel(B_pad, H, tb, T_true):
    H4 = 4 * H
    lane_aligned = (H % 128 == 0)

    def kernel(x_ref, wih_ref, whh_ref, b_ref,
               out_ref, hn_ref, cn_ref,
               h_scr, c_scr, gx_scr):
        blk = pl.program_id(0)

        @pl.when(blk == 0)
        def _init():
            h_scr[...] = jnp.zeros_like(h_scr)
            c_scr[...] = jnp.zeros_like(c_scr)

        # Block-batched input projection (bias folded in). Fills MXU while the
        # step loop below is latency/EUP-bound.
        gx_scr[...] = (
            jnp.dot(x_ref[...].astype(jnp.bfloat16), wih_ref[...],
                    preferred_element_type=jnp.float32)
            + b_ref[...]
        )

        def step(i, carry):
            h, c = carry
            r0 = i * B_pad
            gates = gx_scr[pl.ds(r0, B_pad), :] + jnp.dot(
                h.astype(jnp.bfloat16), whh_ref[...],
                preferred_element_type=jnp.float32)
            if lane_aligned:
                # H % 128 == 0: per-gate slices are lane-aligned blocks (free).
                i_g = jax.nn.sigmoid(gates[:, 0:H])
                f_g = jax.nn.sigmoid(gates[:, H:2 * H])
                g_g = jnp.tanh(gates[:, 2 * H:3 * H])
                o_g = jax.nn.sigmoid(gates[:, 3 * H:4 * H])
            else:
                # H < 128: all gates share one 128-lane vreg -> one full-vreg
                # sigmoid + one tanh slice instead of four partial EUP pushes.
                sig = jax.nn.sigmoid(gates)
                i_g = sig[:, 0:H]
                f_g = sig[:, H:2 * H]
                o_g = sig[:, 3 * H:4 * H]
                g_g = jnp.tanh(gates[:, 2 * H:3 * H])
            c_new = f_g * c + i_g * g_g
            h_new = o_g * jnp.tanh(c_new)
            # Freeze state on padded timesteps (T padded up to a multiple of tb).
            valid = (blk * tb + i) < T_true
            h_new = jnp.where(valid, h_new, h)
            c_new = jnp.where(valid, c_new, c)
            # TODO(synk): for H < 128 in production, pack a lane-dense output
            # slab instead of per-row (B, H) stores (masked vst for H < 128).
            out_ref[pl.ds(r0, B_pad), :] = h_new.astype(out_ref.dtype)
            return h_new, c_new

        h, c = jax.lax.fori_loop(0, tb, step, (h_scr[...], c_scr[...]),
                                 unroll=True)
        h_scr[...] = h
        c_scr[...] = c

        @pl.when(blk == pl.num_programs(0) - 1)
        def _finalize():
            hn_ref[...] = h.astype(hn_ref.dtype)
            cn_ref[...] = c.astype(cn_ref.dtype)

    return kernel


def wd_lstm_fused(x, wih_t_bf16, whh_masked_t_bf16, bias_f32, t_block=16):
    """x: (T, B, I) f32.  Weights pre-transposed: (I,4H) / (H,4H) bf16 (mask applied)."""
    T, B, I = x.shape
    H4 = wih_t_bf16.shape[1]
    H = H4 // 4

    # Pad batch to the f32 sublane pack and time to a multiple of the block.
    B_pad = max(8, _round_up(B, 8))
    tb = min(t_block, T)
    T_pad = _round_up(T, tb)

    x_pad = jnp.zeros((T_pad, B_pad, I), jnp.float32).at[:T, :B, :].set(
        x.astype(jnp.float32))
    x2 = x_pad.reshape(T_pad * B_pad, I)          # seq-major rows; free reshape
    rows_blk = tb * B_pad

    kernel = _make_wd_lstm_kernel(B_pad, H, tb, T)

    # TODO(synk): v7x megacore — add a leading "parallel" batch-chunk grid axis
    # (independent recurrences per TC) once B is large enough for per-core blocks.
    # TODO(synk): v5e — consider pltpu.matmul_push_rhs to hold W_hh on the MXU
    # across the time block if a bundle dump shows vmatmul issue is binding.
    grid_spec = pltpu.PrefetchScalarGridSpec(
        num_scalar_prefetch=0,
        grid=(T_pad // tb,),
        in_specs=(
            pl.BlockSpec((rows_blk, I), lambda t: (t, 0)),   # x rows for this block
            pl.BlockSpec((I, H4), lambda t: (0, 0)),         # W_ih^T (resident)
            pl.BlockSpec((H, H4), lambda t: (0, 0)),         # masked W_hh^T (resident)
            pl.BlockSpec((1, H4), lambda t: (0, 0)),         # b_ih + b_hh
        ),
        out_specs=(
            pl.BlockSpec((rows_blk, H), lambda t: (t, 0)),   # outputs
            pl.BlockSpec((B_pad, H), lambda t: (0, 0)),      # h_n (VMEM-resident)
            pl.BlockSpec((B_pad, H), lambda t: (0, 0)),      # c_n (VMEM-resident)
        ),
        scratch_shapes=[
            pltpu.VMEM((B_pad, H), jnp.float32),             # h state
            pltpu.VMEM((B_pad, H), jnp.float32),             # c state
            pltpu.VMEM((rows_blk, H4), jnp.float32),         # gates_x for the block
        ],
    )

    out2, h_n, c_n = pl.pallas_call(
        kernel,
        out_shape=(
            jax.ShapeDtypeStruct((T_pad * B_pad, H), jnp.float32),
            jax.ShapeDtypeStruct((B_pad, H), jnp.float32),
            jax.ShapeDtypeStruct((B_pad, H), jnp.float32),
        ),
        grid_spec=grid_spec,
        compiler_params=pltpu.CompilerParams(
            dimension_semantics=("arbitrary",),              # recurrence => serial
            vmem_limit_bytes=_vmem_limit_bytes(),
        ),
    )(x2, wih_t_bf16, whh_masked_t_bf16, bias_f32)

    out = out2.reshape(T_pad, B_pad, H)[:T, :B, :]
    return out, h_n[None, :B, :], c_n[None, :B, :]


# --------------------------------------------------------------------------
# WeightDrop forward: dropout on weight_hh_l0_raw (in the wrapper, f32), then
# the wrapped LSTM forward via the fused kernel.
# --------------------------------------------------------------------------
def weight_drop_lstm_forward(x, params, dropout=0.5, rng_key=None,
                             training=True, variational=False, t_block=16):
    """Pass a FRESH rng_key per forward call (PyTorch samples a new mask each time)."""
    w_ih, w_hh_raw, b_ih, b_hh = params
    H4 = w_hh_raw.shape[0]
    if rng_key is None:
        rng_key = jax.random.PRNGKey(0)

    # WeightDrop in f32 (no bf16 double rounding), single cast to bf16 afterwards.
    mask = make_weight_dropout_mask(rng_key, w_hh_raw.shape, dropout,
                                    training, variational)
    whh_masked_t = jnp.transpose(w_hh_raw.astype(jnp.float32) * mask
                                 ).astype(jnp.bfloat16)          # (H, 4H)
    wih_t = jnp.transpose(w_ih).astype(jnp.bfloat16)             # (I, 4H)
    bias = (b_ih + b_hh).astype(jnp.float32).reshape(1, H4)

    out, h_n, c_n = wd_lstm_fused(x, wih_t, whh_masked_t, bias, t_block=t_block)
    return out, (h_n, c_n)


# --------------------------------------------------------------------------
# Pure-JAX reference (f32) for correctness checking.
# --------------------------------------------------------------------------
def _lstm_reference(x, w_ih, w_hh, b_ih, b_hh):
    T, B, _ = x.shape
    H = w_hh.shape[1]
    h = jnp.zeros((B, H), jnp.float32)
    c = jnp.zeros((B, H), jnp.float32)
    outs = []
    for t in range(T):
        gates = x[t] @ w_ih.T + h @ w_hh.T + b_ih + b_hh
        i_g = jax.nn.sigmoid(gates[:, 0:H])
        f_g = jax.nn.sigmoid(gates[:, H:2 * H])
        g_g = jnp.tanh(gates[:, 2 * H:3 * H])
        o_g = jax.nn.sigmoid(gates[:, 3 * H:4 * H])
        c = f_g * c + i_g * g_g
        h = o_g * jnp.tanh(c)
        outs.append(h)
    return jnp.stack(outs), h, c


if __name__ == "__main__":
    # Small shapes implied by the wrapped nn.LSTM: seq=8, batch=2, input=16, hidden=32
    T, B, I, H = 8, 2, 16, 32
    p = 0.5

    key = jax.random.PRNGKey(0)
    k_x, k1, k2, k3, k4, k_drop = jax.random.split(key, 6)

    bound = 1.0 / (H ** 0.5)
    w_ih = jax.random.uniform(k1, (4 * H, I), jnp.float32, -bound, bound)
    w_hh_raw = jax.random.uniform(k2, (4 * H, H), jnp.float32, -bound, bound)
    b_ih = jax.random.uniform(k3, (4 * H,), jnp.float32, -bound, bound)
    b_hh = jax.random.uniform(k4, (4 * H,), jnp.float32, -bound, bound)
    x = jax.random.normal(k_x, (T, B, I), jnp.float32)

    out, (h_n, c_n) = weight_drop_lstm_forward(
        x, (w_ih, w_hh_raw, b_ih, b_hh), dropout=p, rng_key=k_drop,
        training=True, variational=False, t_block=16)
    jax.block_until_ready((out, h_n, c_n))

    assert out.shape == (T, B, H)
    assert h_n.shape == (1, B, H) and c_n.shape == (1, B, H)
    assert bool(jnp.all(jnp.isfinite(out)))

    # Reference check with the SAME dropout mask (bf16 MXU inputs -> loose tol).
    mask_ref = make_weight_dropout_mask(k_drop, w_hh_raw.shape, p, True, False)
    ref_out, ref_h, ref_c = _lstm_reference(x, w_ih, w_hh_raw * mask_ref, b_ih, b_hh)
    assert bool(jnp.allclose(out, ref_out, atol=5e-2, rtol=5e-2))
    assert bool(jnp.allclose(h_n[0], ref_h, atol=5e-2, rtol=5e-2))
    assert bool(jnp.allclose(c_n[0], ref_c, atol=8e-2, rtol=8e-2))

    # Eval path (no dropout) also runs and matches the undropped reference.
    out_eval, (h_e, c_e) = weight_drop_lstm_forward(
        x, (w_ih, w_hh_raw, b_ih, b_hh), dropout=p, rng_key=k_drop, training=False)
    jax.block_until_ready(out_eval)
    ref_out_e, _, _ = _lstm_reference(x, w_ih, w_hh_raw, b_ih, b_hh)
    assert out_eval.shape == (T, B, H)
    assert bool(jnp.allclose(out_eval, ref_out_e, atol=5e-2, rtol=5e-2))

    # Variational path (per-row mask, always applied) also runs.
    out_var, _ = weight_drop_lstm_forward(
        x, (w_ih, w_hh_raw, b_ih, b_hh), dropout=p, rng_key=k_drop,
        training=True, variational=True)
    jax.block_until_ready(out_var)
    assert out_var.shape == (T, B, H)

    print("KERNEL_OK")
</pallas_src>

<mosaic_0001>
module attributes {stable_mosaic.version = 11 : i64} {
  func.func @kernel(%arg0: i32, %arg1: memref<64x16xf32, #tpu.memory_space<vmem>>, %arg2: memref<16x128xbf16, #tpu.memory_space<vmem>>, %arg3: memref<32x128xbf16, #tpu.memory_space<vmem>>, %arg4: memref<1x128xf32, #tpu.memory_space<vmem>>, %arg5: memref<64x32xf32, #tpu.memory_space<vmem>>, %arg6: memref<8x32xf32, #tpu.memory_space<vmem>>, %arg7: memref<8x32xf32, #tpu.memory_space<vmem>>, %arg8: memref<8x32xf32, #tpu.memory_space<vmem>>, %arg9: memref<8x32xf32, #tpu.memory_space<vmem>>, %arg10: memref<64x128xf32, #tpu.memory_space<vmem>>) attributes {dimension_semantics = [#tpu.dimension_semantics<arbitrary>], iteration_bounds = array<i64: 1>, scalar_prefetch = 0 : i64, scratch_operands = 3 : i64, tpu.core_type = #tpu.core_type<tc>, window_params = [{transform_indices = @transform_0, window_bounds = array<i64: 64, 16>}, {pipeline_mode = #tpu.pipeline_mode<synchronous>, transform_indices = @transform_1, window_bounds = array<i64: 16, 128>}, {pipeline_mode = #tpu.pipeline_mode<synchronous>, transform_indices = @transform_2, window_bounds = array<i64: 32, 128>}, {pipeline_mode = #tpu.pipeline_mode<synchronous>, transform_indices = @transform_3, window_bounds = array<i64: 1, 128>}, {transform_indices = @transform_4, window_bounds = array<i64: 64, 32>}, {pipeline_mode = #tpu.pipeline_mode<synchronous>, transform_indices = @transform_5, window_bounds = array<i64: 8, 32>}, {pipeline_mode = #tpu.pipeline_mode<synchronous>, transform_indices = @transform_6, window_bounds = array<i64: 8, 32>}]} {
    %c0_i32 = arith.constant 0 : i32
    %0 = arith.cmpi eq, %arg0, %c0_i32 : i32
    %1 = arith.extui %0 : i1 to i32
    %c0_i32_0 = arith.constant 0 : i32
    %2 = arith.cmpi ne, %1, %c0_i32_0 : i32
    scf.if %2 {
      %cst_91 = arith.constant 0.000000e+00 : f32
      %250 = vector.broadcast %cst_91 : f32 to vector<8x32xf32>
      %c0_92 = arith.constant 0 : index
      %c0_93 = arith.constant 0 : index
      %251 = vector.load %arg8[%c0_92, %c0_93] : memref<8x32xf32, #tpu.memory_space<vmem>>, vector<8x32xf32>
      tpu.vector_store %arg8[%c0_92, %c0_93], %250 {strides = array<i32>} : memref<8x32xf32, #tpu.memory_space<vmem>>, vector<8x32xf32>,
      %cst_94 = arith.constant 0.000000e+00 : f32
      %252 = vector.broadcast %cst_94 : f32 to vector<8x32xf32>
      %c0_95 = arith.constant 0 : index
      %c0_96 = arith.constant 0 : index
      %253 = vector.load %arg9[%c0_95, %c0_96] : memref<8x32xf32, #tpu.memory_space<vmem>>, vector<8x32xf32>
      tpu.vector_store %arg9[%c0_95, %c0_96], %252 {strides = array<i32>} : memref<8x32xf32, #tpu.memory_space<vmem>>, vector<8x32xf32>,
    } else {
    }
    %c0 = arith.constant 0 : index
    %c0_1 = arith.constant 0 : index
    %3 = vector.load %arg1[%c0, %c0_1] : memref<64x16xf32, #tpu.memory_space<vmem>>, vector<64x16xf32>
    %4 = arith.truncf %3 : vector<64x16xf32> to vector<64x16xbf16>
    %c0_2 = arith.constant 0 : index
    %c0_3 = arith.constant 0 : index
    %5 = vector.load %arg2[%c0_2, %c0_3] : memref<16x128xbf16, #tpu.memory_space<vmem>>, vector<16x128xbf16>
    %cst = arith.constant dense<0.000000e+00> : vector<64x128xf32>
    %6 = tpu.matmul %4, %5, %cst {dimension_numbers = #tpu.dot_dimension_numbers<[1], [0], [0], [1], [0, 0, 1, 1], [], []>} : vector<64x16xbf16>, vector<16x128xbf16>, vector<64x128xf32> -> vector<64x128xf32>
    %c0_4 = arith.constant 0 : index
    %c0_5 = arith.constant 0 : index
    %7 = vector.load %arg4[%c0_4, %c0_5] : memref<1x128xf32, #tpu.memory_space<vmem>>, vector<1x128xf32>
    %8 = vector.broadcast %7 : vector<1x128xf32> to vector<64x128xf32>
    %9 = arith.addf %6, %8 : vector<64x128xf32>
    %c0_6 = arith.constant 0 : index
    %c0_7 = arith.constant 0 : index
    %10 = vector.load %arg10[%c0_6, %c0_7] : memref<64x128xf32, #tpu.memory_space<vmem>>, vector<64x128xf32>
    tpu.vector_store %arg10[%c0_6, %c0_7], %9 {strides = array<i32>} : memref<64x128xf32, #tpu.memory_space<vmem>>, vector<64x128xf32>,
    %c0_8 = arith.constant 0 : index
    %c0_9 = arith.constant 0 : index
    %11 = vector.load %arg8[%c0_8, %c0_9] : memref<8x32xf32, #tpu.memory_space<vmem>>, vector<8x32xf32>
    %c0_10 = arith.constant 0 : index
    %c0_11 = arith.constant 0 : index
    %12 = vector.load %arg9[%c0_10, %c0_11] : memref<8x32xf32, #tpu.memory_space<vmem>>, vector<8x32xf32>
    %c0_i32_12 = arith.constant 0 : i32
    %c8_i32 = arith.constant 8 : i32
    %13 = arith.muli %c0_i32_12, %c8_i32 : i32
    %14 = arith.index_cast %13 : i32 to index
    %c0_13 = arith.constant 0 : index
    %15 = vector.load %arg10[%14, %c0_13] : memref<64x128xf32, #tpu.memory_space<vmem>>, vector<8x128xf32>
    %16 = arith.truncf %11 : vector<8x32xf32> to vector<8x32xbf16>
    %c0_14 = arith.constant 0 : index
    %c0_15 = arith.constant 0 : index
    %17 = vector.load %arg3[%c0_14, %c0_15] : memref<32x128xbf16, #tpu.memory_space<vmem>>, vector<32x128xbf16>
    %cst_16 = arith.constant dense<0.000000e+00> : vector<8x128xf32>
    %18 = tpu.matmul %16, %17, %cst_16 {dimension_numbers = #tpu.dot_dimension_numbers<[1], [0], [0], [1], [0, 0, 1, 1], [], []>} : vector<8x32xbf16>, vector<32x128xbf16>, vector<8x128xf32> -> vector<8x128xf32>
    %19 = arith.addf %15, %18 : vector<8x128xf32>
    %20 = arith.negf %19 : vector<8x128xf32>
    %21 = math.exp %20 : vector<8x128xf32>
    %cst_17 = arith.constant 1.000000e+00 : f32
    %22 = vector.broadcast %cst_17 : f32 to vector<8x128xf32>
    %23 = arith.addf %22, %21 : vector<8x128xf32>
    %24 = arith.divf %22, %23 : vector<8x128xf32>
    %25 = vector.extract_strided_slice %24 {offsets = [0, 0], sizes = [8, 32], strides = [1, 1]} : vector<8x128xf32> to vector<8x32xf32>
    %26 = vector.extract_strided_slice %24 {offsets = [0, 32], sizes = [8, 32], strides = [1, 1]} : vector<8x128xf32> to vector<8x32xf32>
    %27 = vector.extract_strided_slice %24 {offsets = [0, 96], sizes = [8, 32], strides = [1, 1]} : vector<8x128xf32> to vector<8x32xf32>
    %28 = vector.extract_strided_slice %19 {offsets = [0, 64], sizes = [8, 32], strides = [1, 1]} : vector<8x128xf32> to vector<8x32xf32>
    %29 = math.tanh %28 : vector<8x32xf32>
    %30 = arith.mulf %26, %12 : vector<8x32xf32>
    %31 = arith.mulf %25, %29 : vector<8x32xf32>
    %32 = arith.addf %30, %31 : vector<8x32xf32>
    %33 = math.tanh %32 : vector<8x32xf32>
    %34 = arith.mulf %27, %33 : vector<8x32xf32>
    %c8_i32_18 = arith.constant 8 : i32
    %35 = arith.muli %arg0, %c8_i32_18 : i32
    %36 = arith.addi %35, %c0_i32_12 : i32
    %c8_i32_19 = arith.constant 8 : i32
    %37 = arith.cmpi slt, %36, %c8_i32_19 : i32
    %38 = arith.select %37, %34, %11 : vector<8x32xf32>
    %39 = arith.select %37, %32, %12 : vector<8x32xf32>
    %40 = arith.index_cast %13 : i32 to index
    %c0_20 = arith.constant 0 : index
    %41 = vector.load %arg5[%40, %c0_20] : memref<64x32xf32, #tpu.memory_space<vmem>>, vector<8x32xf32>
    tpu.vector_store %arg5[%40, %c0_20], %38 {strides = array<i32>} : memref<64x32xf32, #tpu.memory_space<vmem>>, vector<8x32xf32>,
    %c1_i32 = arith.constant 1 : i32
    %c8_i32_21 = arith.constant 8 : i32
    %42 = arith.muli %c1_i32, %c8_i32_21 : i32
    %43 = arith.index_cast %42 : i32 to index
    %c0_22 = arith.constant 0 : index
    %44 = vector.load %arg10[%43, %c0_22] : memref<64x128xf32, #tpu.memory_space<vmem>>, vector<8x128xf32>
    %45 = arith.truncf %38 : vector<8x32xf32> to vector<8x32xbf16>
    %c0_23 = arith.constant 0 : index
    %c0_24 = arith.constant 0 : index
    %46 = vector.load %arg3[%c0_23, %c0_24] : memref<32x128xbf16, #tpu.memory_space<vmem>>, vector<32x128xbf16>
    %cst_25 = arith.constant dense<0.000000e+00> : vector<8x128xf32>
    %47 = tpu.matmul %45, %46, %cst_25 {dimension_numbers = #tpu.dot_dimension_numbers<[1], [0], [0], [1], [0, 0, 1, 1], [], []>} : vector<8x32xbf16>, vector<32x128xbf16>, vector<8x128xf32> -> vector<8x128xf32>
    %48 = arith.addf %44, %47 : vector<8x128xf32>
    %49 = arith.negf %48 : vector<8x128xf32>
    %50 = math.exp %49 : vector<8x128xf32>
    %cst_26 = arith.constant 1.000000e+00 : f32
    %51 = vector.broadcast %cst_26 : f32 to vector<8x128xf32>
    %52 = arith.addf %51, %50 : vector<8x128xf32>
    %53 = arith.divf %51, %52 : vector<8x128xf32>
    %54 = vector.extract_strided_slice %53 {offsets = [0, 0], sizes = [8, 32], strides = [1, 1]} : vector<8x128xf32> to vector<8x32xf32>
    %55 = vector.extract_strided_slice %53 {offsets = [0, 32], sizes = [8, 32], strides = [1, 1]} : vector<8x128xf32> to vector<8x32xf32>
    %56 = vector.extract_strided_slice %53 {offsets = [0, 96], sizes = [8, 32], strides = [1, 1]} : vector<8x128xf32> to vector<8x32xf32>
    %57 = vector.extract_strided_slice %48 {offsets = [0, 64], sizes = [8, 32], strides = [1, 1]} : vector<8x128xf32> to vector<8x32xf32>
    %58 = math.tanh %57 : vector<8x32xf32>
    %59 = arith.mulf %55, %39 : vector<8x32xf32>
    %60 = arith.mulf %54, %58 : vector<8x32xf32>
    %61 = arith.addf %59, %60 : vector<8x32xf32>
    %62 = math.tanh %61 : vector<8x32xf32>
    %63 = arith.mulf %56, %62 : vector<8x32xf32>
    %c8_i32_27 = arith.constant 8 : i32
    %64 = arith.muli %arg0, %c8_i32_27 : i32
    %65 = arith.addi %64, %c1_i32 : i32
    %c8_i32_28 = arith.constant 8 : i32
    %66 = arith.cmpi slt, %65, %c8_i32_28 : i32
    %67 = arith.select %66, %63, %38 : vector<8x32xf32>
    %68 = arith.select %66, %61, %39 : vector<8x32xf32>
    %69 = arith.index_cast %42 : i32 to index
    %c0_29 = arith.constant 0 : index
    %70 = vector.load %arg5[%69, %c0_29] : memref<64x32xf32, #tpu.memory_space<vmem>>, vector<8x32xf32>
    tpu.vector_store %arg5[%69, %c0_29], %67 {strides = array<i32>} : memref<64x32xf32, #tpu.memory_space<vmem>>, vector<8x32xf32>,
    %c2_i32 = arith.constant 2 : i32
    %c8_i32_30 = arith.constant 8 : i32
    %71 = arith.muli %c2_i32, %c8_i32_30 : i32
    %72 = arith.index_cast %71 : i32 to index
    %c0_31 = arith.constant 0 : index
    %73 = vector.load %arg10[%72, %c0_31] : memref<64x128xf32, #tpu.memory_space<vmem>>, vector<8x128xf32>
    %74 = arith.truncf %67 : vector<8x32xf32> to vector<8x32xbf16>
    %c0_32 = arith.constant 0 : index
    %c0_33 = arith.constant 0 : index
    %75 = vector.load %arg3[%c0_32, %c0_33] : memref<32x128xbf16, #tpu.memory_space<vmem>>, vector<32x128xbf16>
    %cst_34 = arith.constant dense<0.000000e+00> : vector<8x128xf32>
    %76 = tpu.matmul %74, %75, %cst_34 {dimension_numbers = #tpu.dot_dimension_numbers<[1], [0], [0], [1], [0, 0, 1, 1], [], []>} : vector<8x32xbf16>, vector<32x128xbf16>, vector<8x128xf32> -> vector<8x128xf32>
    %77 = arith.addf %73, %76 : vector<8x128xf32>
    %78 = arith.negf %77 : vector<8x128xf32>
    %79 = math.exp %78 : vector<8x128xf32>
    %cst_35 = arith.constant 1.000000e+00 : f32
    %80 = vector.broadcast %cst_35 : f32 to vector<8x128xf32>
    %81 = arith.addf %80, %79 : vector<8x128xf32>
    %82 = arith.divf %80, %81 : vector<8x128xf32>
    %83 = vector.extract_strided_slice %82 {offsets = [0, 0], sizes = [8, 32], strides = [1, 1]} : vector<8x128xf32> to vector<8x32xf32>
    %84 = vector.extract_strided_slice %82 {offsets = [0, 32], sizes = [8, 32], strides = [1, 1]} : vector<8x128xf32> to vector<8x32xf32>
    %85 = vector.extract_strided_slice %82 {offsets = [0, 96], sizes = [8, 32], strides = [1, 1]} : vector<8x128xf32> to vector<8x32xf32>
    %86 = vector.extract_strided_slice %77 {offsets = [0, 64], sizes = [8, 32], strides = [1, 1]} : vector<8x128xf32> to vector<8x32xf32>
    %87 = math.tanh %86 : vector<8x32xf32>
    %88 = arith.mulf %84, %68 : vector<8x32xf32>
    %89 = arith.mulf %83, %87 : vector<8x32xf32>
    %90 = arith.addf %88, %89 : vector<8x32xf32>
    %91 = math.tanh %90 : vector<8x32xf32>
    %92 = arith.mulf %85, %91 : vector<8x32xf32>
    %c8_i32_36 = arith.constant 8 : i32
    %93 = arith.muli %arg0, %c8_i32_36 : i32
    %94 = arith.addi %93, %c2_i32 : i32
    %c8_i32_37 = arith.constant 8 : i32
    %95 = arith.cmpi slt, %94, %c8_i32_37 : i32
    %96 = arith.select %95, %92, %67 : vector<8x32xf32>
    %97 = arith.select %95, %90, %68 : vector<8x32xf32>
    %98 = arith.index_cast %71 : i32 to index
    %c0_38 = arith.constant 0 : index
    %99 = vector.load %arg5[%98, %c0_38] : memref<64x32xf32, #tpu.memory_space<vmem>>, vector<8x32xf32>
    tpu.vector_store %arg5[%98, %c0_38], %96 {strides = array<i32>} : memref<64x32xf32, #tpu.memory_space<vmem>>, vector<8x32xf32>,
    %c3_i32 = arith.constant 3 : i32
    %c8_i32_39 = arith.constant 8 : i32
    %100 = arith.muli %c3_i32, %c8_i32_39 : i32
    %101 = arith.index_cast %100 : i32 to index
    %c0_40 = arith.constant 0 : index
    %102 = vector.load %arg10[%101, %c0_40] : memref<64x128xf32, #tpu.memory_space<vmem>>, vector<8x128xf32>
    %103 = arith.truncf %96 : vector<8x32xf32> to vector<8x32xbf16>
    %c0_41 = arith.constant 0 : index
    %c0_42 = arith.constant 0 : index
    %104 = vector.load %arg3[%c0_41, %c0_42] : memref<32x128xbf16, #tpu.memory_space<vmem>>, vector<32x128xbf16>
    %cst_43 = arith.constant dense<0.000000e+00> : vector<8x128xf32>
    %105 = tpu.matmul %103, %104, %cst_43 {dimension_numbers = #tpu.dot_dimension_numbers<[1], [0], [0], [1], [0, 0, 1, 1], [], []>} : vector<8x32xbf16>, vector<32x128xbf16>, vector<8x128xf32> -> vector<8x128xf32>
    %106 = arith.addf %102, %105 : vector<8x128xf32>
    %107 = arith.negf %106 : vector<8x128xf32>
    %108 = math.exp %107 : vector<8x128xf32>
    %cst_44 = arith.constant 1.000000e+00 : f32
    %109 = vector.broadcast %cst_44 : f32 to vector<8x128xf32>
    %110 = arith.addf %109, %108 : vector<8x128xf32>
    %111 = arith.divf %109, %110 : vector<8x128xf32>
    %112 = vector.extract_strided_slice %111 {offsets = [0, 0], sizes = [8, 32], strides = [1, 1]} : vector<8x128xf32> to vector<8x32xf32>
    %113 = vector.extract_strided_slice %111 {offsets = [0, 32], sizes = [8, 32], strides = [1, 1]} : vector<8x128xf32> to vector<8x32xf32>
    %114 = vector.extract_strided_slice %111 {offsets = [0, 96], sizes = [8, 32], strides = [1, 1]} : vector<8x128xf32> to vector<8x32xf32>
    %115 = vector.extract_strided_slice %106 {offsets = [0, 64], sizes = [8, 32], strides = [1, 1]} : vector<8x128xf32> to vector<8x32xf32>
    %116 = math.tanh %115 : vector<8x32xf32>
    %117 = arith.mulf %113, %97 : vector<8x32xf32>
    %118 = arith.mulf %112, %116 : vector<8x32xf32>
    %119 = arith.addf %117, %118 : vector<8x32xf32>
    %120 = math.tanh %119 : vector<8x32xf32>
    %121 = arith.mulf %114, %120 : vector<8x32xf32>
    %c8_i32_45 = arith.constant 8 : i32
    %122 = arith.muli %arg0, %c8_i32_45 : i32
    %123 = arith.addi %122, %c3_i32 : i32
    %c8_i32_46 = arith.constant 8 : i32
    %124 = arith.cmpi slt, %123, %c8_i32_46 : i32
    %125 = arith.select %124, %121, %96 : vector<8x32xf32>
    %126 = arith.select %124, %119, %97 : vector<8x32xf32>
    %127 = arith.index_cast %100 : i32 to index
    %c0_47 = arith.constant 0 : index
    %128 = vector.load %arg5[%127, %c0_47] : memref<64x32xf32, #tpu.memory_space<vmem>>, vector<8x32xf32>
    tpu.vector_store %arg5[%127, %c0_47], %125 {strides = array<i32>} : memref<64x32xf32, #tpu.memory_space<vmem>>, vector<8x32xf32>,
    %c4_i32 = arith.constant 4 : i32
    %c8_i32_48 = arith.constant 8 : i32
    %129 = arith.muli %c4_i32, %c8_i32_48 : i32
    %130 = arith.index_cast %129 : i32 to index
    %c0_49 = arith.constant 0 : index
    %131 = vector.load %arg10[%130, %c0_49] : memref<64x128xf32, #tpu.memory_space<vmem>>, vector<8x128xf32>
    %132 = arith.truncf %125 : vector<8x32xf32> to vector<8x32xbf16>
    %c0_50 = arith.constant 0 : index
    %c0_51 = arith.constant 0 : index
    %133 = vector.load %arg3[%c0_50, %c0_51] : memref<32x128xbf16, #tpu.memory_space<vmem>>, vector<32x128xbf16>
    %cst_52 = arith.constant dense<0.000000e+00> : vector<8x128xf32>
    %134 = tpu.matmul %132, %133, %cst_52 {dimension_numbers = #tpu.dot_dimension_numbers<[1], [0], [0], [1], [0, 0, 1, 1], [], []>} : vector<8x32xbf16>, vector<32x128xbf16>, vector<8x128xf32> -> vector<8x128xf32>
    %135 = arith.addf %131, %134 : vector<8x128xf32>
    %136 = arith.negf %135 : vector<8x128xf32>
    %137 = math.exp %136 : vector<8x128xf32>
    %cst_53 = arith.constant 1.000000e+00 : f32
    %138 = vector.broadcast %cst_53 : f32 to vector<8x128xf32>
    %139 = arith.addf %138, %137 : vector<8x128xf32>
    %140 = arith.divf %138, %139 : vector<8x128xf32>
    %141 = vector.extract_strided_slice %140 {offsets = [0, 0], sizes = [8, 32], strides = [1, 1]} : vector<8x128xf32> to vector<8x32xf32>
    %142 = vector.extract_strided_slice %140 {offsets = [0, 32], sizes = [8, 32], strides = [1, 1]} : vector<8x128xf32> to vector<8x32xf32>
    %143 = vector.extract_strided_slice %140 {offsets = [0, 96], sizes = [8, 32], strides = [1, 1]} : vector<8x128xf32> to vector<8x32xf32>
    %144 = vector.extract_strided_slice %135 {offsets = [0, 64], sizes = [8, 32], strides = [1, 1]} : vector<8x128xf32> to vector<8x32xf32>
    %145 = math.tanh %144 : vector<8x32xf32>
    %146 = arith.mulf %142, %126 : vector<8x32xf32>
    %147 = arith.mulf %141, %145 : vector<8x32xf32>
    %148 = arith.addf %146, %147 : vector<8x32xf32>
    %149 = math.tanh %148 : vector<8x32xf32>
    %150 = arith.mulf %143, %149 : vector<8x32xf32>
    %c8_i32_54 = arith.constant 8 : i32
    %151 = arith.muli %arg0, %c8_i32_54 : i32
    %152 = arith.addi %151, %c4_i32 : i32
    %c8_i32_55 = arith.constant 8 : i32
    %153 = arith.cmpi slt, %152, %c8_i32_55 : i32
    %154 = arith.select %153, %150, %125 : vector<8x32xf32>
    %155 = arith.select %153, %148, %126 : vector<8x32xf32>
    %156 = arith.index_cast %129 : i32 to index
    %c0_56 = arith.constant 0 : index
    %157 = vector.load %arg5[%156, %c0_56] : memref<64x32xf32, #tpu.memory_space<vmem>>, vector<8x32xf32>
    tpu.vector_store %arg5[%156, %c0_56], %154 {strides = array<i32>} : memref<64x32xf32, #tpu.memory_space<vmem>>, vector<8x32xf32>,
    %c5_i32 = arith.constant 5 : i32
    %c8_i32_57 = arith.constant 8 : i32
    %158 = arith.muli %c5_i32, %c8_i32_57 : i32
    %159 = arith.index_cast %158 : i32 to index
    %c0_58 = arith.constant 0 : index
    %160 = vector.load %arg10[%159, %c0_58] : memref<64x128xf32, #tpu.memory_space<vmem>>, vector<8x128xf32>
    %161 = arith.truncf %154 : vector<8x32xf32> to vector<8x32xbf16>
    %c0_59 = arith.constant 0 : index
    %c0_60 = arith.constant 0 : index
    %162 = vector.load %arg3[%c0_59, %c0_60] : memref<32x128xbf16, #tpu.memory_space<vmem>>, vector<32x128xbf16>
    %cst_61 = arith.constant dense<0.000000e+00> : vector<8x128xf32>
    %163 = tpu.matmul %161, %162, %cst_61 {dimension_numbers = #tpu.dot_dimension_numbers<[1], [0], [0], [1], [0, 0, 1, 1], [], []>} : vector<8x32xbf16>, vector<32x128xbf16>, vector<8x128xf32> -> vector<8x128xf32>
    %164 = arith.addf %160, %163 : vector<8x128xf32>
    %165 = arith.negf %164 : vector<8x128xf32>
    %166 = math.exp %165 : vector<8x128xf32>
    %cst_62 = arith.constant 1.000000e+00 : f32
    %167 = vector.broadcast %cst_62 : f32 to vector<8x128xf32>
    %168 = arith.addf %167, %166 : vector<8x128xf32>
    %169 = arith.divf %167, %168 : vector<8x128xf32>
    %170 = vector.extract_strided_slice %169 {offsets = [0, 0], sizes = [8, 32], strides = [1, 1]} : vector<8x128xf32> to vector<8x32xf32>
    %171 = vector.extract_strided_slice %169 {offsets = [0, 32], sizes = [8, 32], strides = [1, 1]} : vector<8x128xf32> to vector<8x32xf32>
    %172 = vector.extract_strided_slice %169 {offsets = [0, 96], sizes = [8, 32], strides = [1, 1]} : vector<8x128xf32> to vector<8x32xf32>
    %173 = vector.extract_strided_slice %164 {offsets = [0, 64], sizes = [8, 32], strides = [1, 1]} : vector<8x128xf32> to vector<8x32xf32>
    %174 = math.tanh %173 : vector<8x32xf32>
    %175 = arith.mulf %171, %155 : vector<8x32xf32>
    %176 = arith.mulf %170, %174 : vector<8x32xf32>
    %177 = arith.addf %175, %176 : vector<8x32xf32>
    %178 = math.tanh %177 : vector<8x32xf32>
    %179 = arith.mulf %172, %178 : vector<8x32xf32>
    %c8_i32_63 = arith.constant 8 : i32
    %180 = arith.muli %arg0, %c8_i32_63 : i32
    %181 = arith.addi %180, %c5_i32 : i32
    %c8_i32_64 = arith.constant 8 : i32
    %182 = arith.cmpi slt, %181, %c8_i32_64 : i32
    %183 = arith.select %182, %179, %154 : vector<8x32xf32>
    %184 = arith.select %182, %177, %155 : vector<8x32xf32>
    %185 = arith.index_cast %158 : i32 to index
    %c0_65 = arith.constant 0 : index
    %186 = vector.load %arg5[%185, %c0_65] : memref<64x32xf32, #tpu.memory_space<vmem>>, vector<8x32xf32>
    tpu.vector_store %arg5[%185, %c0_65], %183 {strides = array<i32>} : memref<64x32xf32, #tpu.memory_space<vmem>>, vector<8x32xf32>,
    %c6_i32 = arith.constant 6 : i32
    %c8_i32_66 = arith.constant 8 : i32
    %187 = arith.muli %c6_i32, %c8_i32_66 : i32
    %188 = arith.index_cast %187 : i32 to index
    %c0_67 = arith.constant 0 : index
    %189 = vector.load %arg10[%188, %c0_67] : memref<64x128xf32, #tpu.memory_space<vmem>>, vector<8x128xf32>
    %190 = arith.truncf %183 : vector<8x32xf32> to vector<8x32xbf16>
    %c0_68 = arith.constant 0 : index
    %c0_69 = arith.constant 0 : index
    %191 = vector.load %arg3[%c0_68, %c0_69] : memref<32x128xbf16, #tpu.memory_space<vmem>>, vector<32x128xbf16>
    %cst_70 = arith.constant dense<0.000000e+00> : vector<8x128xf32>
    %192 = tpu.matmul %190, %191, %cst_70 {dimension_numbers = #tpu.dot_dimension_numbers<[1], [0], [0], [1], [0, 0, 1, 1], [], []>} : vector<8x32xbf16>, vector<32x128xbf16>, vector<8x128xf32> -> vector<8x128xf32>
    %193 = arith.addf %189, %192 : vector<8x128xf32>
    %194 = arith.negf %193 : vector<8x128xf32>
    %195 = math.exp %194 : vector<8x128xf32>
    %cst_71 = arith.constant 1.000000e+00 : f32
    %196 = vector.broadcast %cst_71 : f32 to vector<8x128xf32>
    %197 = arith.addf %196, %195 : vector<8x128xf32>
    %198 = arith.divf %196, %197 : vector<8x128xf32>
    %199 = vector.extract_strided_slice %198 {offsets = [0, 0], sizes = [8, 32], strides = [1, 1]} : vector<8x128xf32> to vector<8x32xf32>
    %200 = vector.extract_strided_slice %198 {offsets = [0, 32], sizes = [8, 32], strides = [1, 1]} : vector<8x128xf32> to vector<8x32xf32>
    %201 = vector.extract_strided_slice %198 {offsets = [0, 96], sizes = [8, 32], strides = [1, 1]} : vector<8x128xf32> to vector<8x32xf32>
    %202 = vector.extract_strided_slice %193 {offsets = [0, 64], sizes = [8, 32], strides = [1, 1]} : vector<8x128xf32> to vector<8x32xf32>
    %203 = math.tanh %202 : vector<8x32xf32>
    %204 = arith.mulf %200, %184 : vector<8x32xf32>
    %205 = arith.mulf %199, %203 : vector<8x32xf32>
    %206 = arith.addf %204, %205 : vector<8x32xf32>
    %207 = math.tanh %206 : vector<8x32xf32>
    %208 = arith.mulf %201, %207 : vector<8x32xf32>
    %c8_i32_72 = arith.constant 8 : i32
    %209 = arith.muli %arg0, %c8_i32_72 : i32
    %210 = arith.addi %209, %c6_i32 : i32
    %c8_i32_73 = arith.constant 8 : i32
    %211 = arith.cmpi slt, %210, %c8_i32_73 : i32
    %212 = arith.select %211, %208, %183 : vector<8x32xf32>
    %213 = arith.select %211, %206, %184 : vector<8x32xf32>
    %214 = arith.index_cast %187 : i32 to index
    %c0_74 = arith.constant 0 : index
    %215 = vector.load %arg5[%214, %c0_74] : memref<64x32xf32, #tpu.memory_space<vmem>>, vector<8x32xf32>
    tpu.vector_store %arg5[%214, %c0_74], %212 {strides = array<i32>} : memref<64x32xf32, #tpu.memory_space<vmem>>, vector<8x32xf32>,
    %c7_i32 = arith.constant 7 : i32
    %c8_i32_75 = arith.constant 8 : i32
    %216 = arith.muli %c7_i32, %c8_i32_75 : i32
    %217 = arith.index_cast %216 : i32 to index
    %c0_76 = arith.constant 0 : index
    %218 = vector.load %arg10[%217, %c0_76] : memref<64x128xf32, #tpu.memory_space<vmem>>, vector<8x128xf32>
    %219 = arith.truncf %212 : vector<8x32xf32> to vector<8x32xbf16>
    %c0_77 = arith.constant 0 : index
    %c0_78 = arith.constant 0 : index
    %220 = vector.load %arg3[%c0_77, %c0_78] : memref<32x128xbf16, #tpu.memory_space<vmem>>, vector<32x128xbf16>
    %cst_79 = arith.constant dense<0.000000e+00> : vector<8x128xf32>
    %221 = tpu.matmul %219, %220, %cst_79 {dimension_numbers = #tpu.dot_dimension_numbers<[1], [0], [0], [1], [0, 0, 1, 1], [], []>} : vector<8x32xbf16>, vector<32x128xbf16>, vector<8x128xf32> -> vector<8x128xf32>
    %222 = arith.addf %218, %221 : vector<8x128xf32>
    %223 = arith.negf %222 : vector<8x128xf32>
    %224 = math.exp %223 : vector<8x128xf32>
    %cst_80 = arith.constant 1.000000e+00 : f32
    %225 = vector.broadcast %cst_80 : f32 to vector<8x128xf32>
    %226 = arith.addf %225, %224 : vector<8x128xf32>
    %227 = arith.divf %225, %226 : vector<8x128xf32>
    %228 = vector.extract_strided_slice %227 {offsets = [0, 0], sizes = [8, 32], strides = [1, 1]} : vector<8x128xf32> to vector<8x32xf32>
    %229 = vector.extract_strided_slice %227 {offsets = [0, 32], sizes = [8, 32], strides = [1, 1]} : vector<8x128xf32> to vector<8x32xf32>
    %230 = vector.extract_strided_slice %227 {offsets = [0, 96], sizes = [8, 32], strides = [1, 1]} : vector<8x128xf32> to vector<8x32xf32>
    %231 = vector.extract_strided_slice %222 {offsets = [0, 64], sizes = [8, 32], strides = [1, 1]} : vector<8x128xf32> to vector<8x32xf32>
    %232 = math.tanh %231 : vector<8x32xf32>
    %233 = arith.mulf %229, %213 : vector<8x32xf32>
    %234 = arith.mulf %228, %232 : vector<8x32xf32>
    %235 = arith.addf %233, %234 : vector<8x32xf32>
    %236 = math.tanh %235 : vector<8x32xf32>
    %237 = arith.mulf %230, %236 : vector<8x32xf32>
    %c8_i32_81 = arith.constant 8 : i32
    %238 = arith.muli %arg0, %c8_i32_81 : i32
    %239 = arith.addi %238, %c7_i32 : i32
    %c8_i32_82 = arith.constant 8 : i32
    %240 = arith.cmpi slt, %239, %c8_i32_82 : i32
    %241 = arith.select %240, %237, %212 : vector<8x32xf32>
    %242 = arith.select %240, %235, %213 : vector<8x32xf32>
    %243 = arith.index_cast %216 : i32 to index
    %c0_83 = arith.constant 0 : index
    %244 = vector.load %arg5[%243, %c0_83] : memref<64x32xf32, #tpu.memory_space<vmem>>, vector<8x32xf32>
    tpu.vector_store %arg5[%243, %c0_83], %241 {strides = array<i32>} : memref<64x32xf32, #tpu.memory_space<vmem>>, vector<8x32xf32>,
    %c8_i32_84 = arith.constant 8 : i32
    %c0_85 = arith.constant 0 : index
    %c0_86 = arith.constant 0 : index
    %245 = vector.load %arg8[%c0_85, %c0_86] : memref<8x32xf32, #tpu.memory_space<vmem>>, vector<8x32xf32>
    tpu.vector_store %arg8[%c0_85, %c0_86], %241 {strides = array<i32>} : memref<8x32xf32, #tpu.memory_space<vmem>>, vector<8x32xf32>,
    %c0_87 = arith.constant 0 : index
    %c0_88 = arith.constant 0 : index
    %246 = vector.load %arg9[%c0_87, %c0_88] : memref<8x32xf32, #tpu.memory_space<vmem>>, vector<8x32xf32>
    tpu.vector_store %arg9[%c0_87, %c0_88], %242 {strides = array<i32>} : memref<8x32xf32, #tpu.memory_space<vmem>>, vector<8x32xf32>,
    %c0_i32_89 = arith.constant 0 : i32
    %247 = arith.cmpi eq, %arg0, %c0_i32_89 : i32
    %248 = arith.extui %247 : i1 to i32
    %c0_i32_90 = arith.constant 0 : i32
    %249 = arith.cmpi ne, %248, %c0_i32_90 : i32
    scf.if %249 {
      %c0_91 = arith.constant 0 : index
      %c0_92 = arith.constant 0 : index
      %250 = vector.load %arg6[%c0_91, %c0_92] : memref<8x32xf32, #tpu.memory_space<vmem>>, vector<8x32xf32>
      tpu.vector_store %arg6[%c0_91, %c0_92], %241 {strides = array<i32>} : memref<8x32xf32, #tpu.memory_space<vmem>>, vector<8x32xf32>,
      %c0_93 = arith.constant 0 : index
      %c0_94 = arith.constant 0 : index
      %251 = vector.load %arg7[%c0_93, %c0_94] : memref<8x32xf32, #tpu.memory_space<vmem>>, vector<8x32xf32>
      tpu.vector_store %arg7[%c0_93, %c0_94], %242 {strides = array<i32>} : memref<8x32xf32, #tpu.memory_space<vmem>>, vector<8x32xf32>,
    } else {
    }
    return
  }
  func.func @transform_0(%arg0: i32) -> (i32, i32) {
    %c0_i32 = arith.constant 0 : i32
    %c0_i32_0 = arith.constant 0 : i32
    return %arg0, %c0_i32 : i32, i32
  }
  func.func @transform_1(%arg0: i32) -> (i32, i32) {
    %c0_i32 = arith.constant 0 : i32
    %c0_i32_0 = arith.constant 0 : i32
    %c0_i32_1 = arith.constant 0 : i32
    return %c0_i32, %c0_i32_0 : i32, i32
  }
  func.func @transform_2(%arg0: i32) -> (i32, i32) {
    %c0_i32 = arith.constant 0 : i32
    %c0_i32_0 = arith.constant 0 : i32
    %c0_i32_1 = arith.constant 0 : i32
    return %c0_i32, %c0_i32_0 : i32, i32
  }
  func.func @transform_3(%arg0: i32) -> (i32, i32) {
    %c0_i32 = arith.constant 0 : i32
    %c0_i32_0 = arith.constant 0 : i32
    %c0_i32_1 = arith.constant 0 : i32
    return %c0_i32, %c0_i32_0 : i32, i32
  }
  func.func @transform_4(%arg0: i32) -> (i32, i32) {
    %c0_i32 = arith.constant 0 : i32
    %c0_i32_0 = arith.constant 0 : i32
    return %arg0, %c0_i32 : i32, i32
  }
  func.func @transform_5(%arg0: i32) -> (i32, i32) {
    %c0_i32 = arith.constant 0 : i32
    %c0_i32_0 = arith.constant 0 : i32
    %c0_i32_1 = arith.constant 0 : i32
    return %c0_i32, %c0_i32_0 : i32, i32
  }
  func.func @transform_6(%arg0: i32) -> (i32, i32) {
    %c0_i32 = arith.constant 0 : i32
    %c0_i32_0 = arith.constant 0 : i32
    %c0_i32_1 = arith.constant 0 : i32
    return %c0_i32, %c0_i32_0 : i32, i32
  }
}

</mosaic_0001>

<bundles_post_ra>
// kernel: tpu_custom_call.1
= control target key start
LH: loop header
LB: loop body
LE: loop exit
PB: predicated region body
PF: predicated region fallthrough
CT: control target
= control target key end

     0   :  { %12 = vsyncpa [#allocation6], 0  ;;  %v1275_v1 = vmov 0.0   ;;  %vm57_vm0 = vcmask 130048   ;;  %vm27_vm1 = vcmask 261120   ;;  %vm1276_vm2 = vmmov 0   ;;  %s1583_s0 = inlined_call_operand.vmem [shape: f32[64,16], index: 0, kind: input, shape index: {}]   ;;  %s1584_s1 = inlined_call_operand.vmem [shape: bf16[16,128], index: 1, kind: input, shape index: {}]   ;;  %s1585_s2 = inlined_call_operand.vmem [shape: bf16[32,128], index: 2, kind: input, shape index: {}]   ;;  %s1586_s3 = inlined_call_operand.vmem [shape: f32[1,128], index: 3, kind: input, shape index: {}]   ;;  %s1587_s4 = inlined_call_operand.vmem [shape: f32[64,32], index: 4, kind: output, shape index: {0}]   ;;  %s1588_s5 = inlined_call_operand.hbm [shape: f32[8,32], index: 5, kind: output, shape index: {1}]   ;;  %s1589_s6 = inlined_call_operand.hbm [shape: f32[8,32], index: 6, kind: output, shape index: {2}]  }
   0x1   :  { %v1150_v0 = vld [vmem:[%s1584_s1] sm:$0xff]   ;;  %1079 = vmatprep.subr.bf16.mxu1 %v1275_v1  ;;  %v1151_v2 = vld [vmem:[%s1585_s2 + $0x8] sm:$0xff]   ;;  %v32_v5 = vld [vmem:[%s1583_s0 + $0x10] sm:$0xff]  ;;  %28 = vst.msk [vmem:[#allocation2] sm:$0xff] %vm27_vm1, %v1275_v1  ;;  %1083 = vmatprep.mubr.msk.bf16.mxu1 %vm1276_vm2, %v1275_v1 }
   0x2   :  { %1069 = vmatprep.subr.bf16.mxu0 %v1150_v0  ;;  %v30_v3 = vld [vmem:[%s1583_s0] sm:$0xff]  ;;  %v31_v4 = vld [vmem:[%s1583_s0 + $0x8] sm:$0xff]  ;;  %1080 = vmatpush3.bf16.msra.mxu1 %v1151_v2  ;;  %v33_v7 = vld [vmem:[%s1583_s0 + $0x18] sm:$0xff]  ;;  %29 = vst.msk [vmem:[#allocation3] sm:$0xff] %vm27_vm1, %v1275_v1 }
   0x3   :  { %1070 = vmatpush3.bf16.msra.mxu0 %v1150_v0  ;;  %v38_v6 = vpack.c.bf16 %v31_v4, %v30_v3  ;;  %v39_v8 = vpack.c.bf16 %v33_v7, %v32_v5  ;;  %1081 = vmatprep.subr.bf16.mxu1 %v1275_v1  ;;  %v1152_v9 = vld [vmem:[%s1585_s2] sm:$0xff]  }
   0x4   :  { %1095 = vmatprep.subr.bf16.mxu0 %v1275_v1 }
   0x5   :  { %1071 = vmatprep.mubr.msk.bf16.mxu0 %vm57_vm0, %v38_v6 }
   0x6   :  { %1072 = vmatmul.mubr.msk.bf16.vlgmr.msra.gmra.mxu0 %vm57_vm0, %v39_v8  ;;  %1082 = vmatpush3.bf16.msra.mxu1 %v1152_v9 }
   0x7   :  { %1087 = vmatprep.subr.bf16.mxu1 %v1275_v1 }
   0x8   :  { %v143_v10 = vld [vmem:[#allocation2] sm:$0xff] }
   0x9   :  { %v146_v11 = vpack.c.bf16 %v143_v10, %v143_v10 }
   0xb   :  { %1084 = vmatmul.mubr.msk.bf16.vlgmr.msra.gmra.mxu1 %vm27_vm1, %v146_v11 }
   0xc   :  { %1091 = vmatprep.mubr.msk.bf16.mxu1 %vm1276_vm2, %v1275_v1 }
   0xd   :  { %13 = vsyncpa [#allocation8], 0  ;;  %v1358_v13 = vld [vmem:[%s1586_s3] ss:$0 sm:$0xff]  ;;  %s1277_s12 = smov 64   ;;  %v144_v22 = vld [vmem:[#allocation3] sm:$0xff] }
   0xe   :  { %s1278_s13 = smov 32   ;;  %v1153_v33 = vld [vmem:[%s1585_s2 + $0x8] sm:$0xff]   ;;  %v1154_v34 = vld [vmem:[%s1585_s2] sm:$0xff]   ;;  %v36_v62 = vld [vmem:[%s1583_s0 + $0x30] sm:$0xff]  ;;  %s1280_s29 = smov [#allocation7]  }
   0xf   :  { %1088 = vmatpush3.bf16.msra.mxu1 %v1153_v33  ;;  %v1155_v58 = vld [vmem:[%s1585_s2 + $0x8] sm:$0xff]   ;;  %v34_v59 = vld [vmem:[%s1583_s0 + $0x20] sm:$0xff]  ;;  %v37_v63 = vld [vmem:[%s1583_s0 + $0x38] sm:$0xff]  ;;  %s988_s30 = sshll.u32 %s1280_s29, 4  ;;  %s989_s30 = int_to_ptr.vmem [resolvable:$true] %s988_s30 }
  0x10   :  { %1089 = vmatprep.subr.bf16.mxu1 %v1275_v1  ;;  %v35_v60 = vld [vmem:[%s1583_s0 + $0x28] sm:$0xff]  ;;  %1096 = vmatpush3.bf16.msra.mxu0 %v1155_v58  ;;  %v41_v0 = vpack.c.bf16 %v37_v63, %v36_v62  ;;  %v1156_v2 = vld [vmem:[%s1585_s2] sm:$0xff]   ;;  %s1279_s0 = smov 96   ;;  %p1236_p1 = scmp.lt.s32.totalorder %s989_s30, %s989_s30 }
  0x11   :  { %v40_v61 = vpack.c.bf16 %v35_v60, %v34_v59  ;;  %1097 = vmatprep.subr.bf16.mxu0 %v1275_v1 }
  0x13   :  { %1090 = vmatpush3.bf16.msra.mxu1 %v1154_v34  ;;  %1075 = vmatprep.mubr.msk.bf16.mxu0 %vm57_vm0, %v40_v61 }
  0x14   :  { %1103 = vmatprep.subr.bf16.mxu1 %v1275_v1  ;;  %1076 = vmatmul.mubr.msk.bf16.gmra.mxu0 %vm57_vm0, %v41_v0 }
  0x15   :  { %1099 = vmatprep.mubr.msk.bf16.mxu0 %vm1276_vm2, %v1275_v1  ;;  %1098 = vmatpush3.bf16.msra.mxu0 %v1156_v2 }
  0x16   :  { %1111 = vmatprep.subr.bf16.mxu0 %v1275_v1 }
  0xc6   :  { %v1353_v12 = vpop.f32.mrf.mxu0 }
  0xc8   :  { %v104_v14 = vpop.f32.mrf.mxu0 }
  0xc9   :  { %v105_v15 = vadd.f32 %v1358_v13, %v104_v14  ;;  %v113_v14 = vadd.f32 %v1353_v12, %v1358_v13 }
  0xca   :  { %v1381_v40 = vpop.f32.mrf.mxu0 }
  0xcb   :  { %v201_v16 = vpop.f32.mrf.mxu1 }
  0xcc   :  { %v207_v17 = vadd.f32 %v201_v16, %v105_v15  ;;  %v107_v41 = vpop.f32.mrf.mxu0 }
  0xcd   :  { %v1085_v18 = vpop.f32.mrf.mxu1  ;;  %v108_v42 = vadd.f32 %v1358_v13, %v107_v41 }
  0xce   :  { %1167 = vtanh.f32 %v207_v17  ;;  %v1011_v23 = vmul.f32 -1.442695, %v207_v17 }
  0xcf   :  { %v204_v19 = vpop.f32.mrf.mxu1 }
  0xd0   :  { %1169 = vpow2.f32 %v1011_v23 }
  0xd1   :  { %v1086_v20 = vpop.f32.mrf.mxu1 }
  0xd4   :  { %v1419_v8 = vpop.f32.mrf.mxu0 }
  0xd6   :  { %v1421_v9 = vpop.f32.mrf.mxu0 }
  0xd7   :  { %v121_v60 = vadd.f32 %v1358_v13, %v1421_v9 }
  0xd8   :  { %v1423_v10 = vpop.f32.mrf.mxu0 }
  0xda   :  { %v1425_v11 = vpop.f32.mrf.mxu0 }
  0xdb   :  { %v1168_v21 = vpop.eup %1167 }
  0xdc   :  { %221 = vrot.lane.b32.xlu0 %v1168_v21, %s1277_s12 }
  0xdd   :  { %v1170_v24 = vpop.eup %1169 }
  0xde   :  { %v211_v25 = vadd.f32 1.0, %v1170_v24 }
  0xe0   :  { %216 = vrot.lane.b32.xlu0 %v144_v22, %s1278_s13  ;;  %1171 = vrcp.f32 %v211_v25 }
  0xed   :  { %v1172_v26 = vpop.eup %1171 }
 0x14e   :  { %v222_v27 = vpop.permute.xlu0 %221 }
 0x14f   :  { %v224_v28 = vmul.f32 %v1172_v26, %v222_v27 }
 0x151   :  { %226 = vrot.lane.b32.xlu1 %v224_v28, %s1278_s13 }
 0x152   :  { %v217_v29 = vpop.permute.xlu0 %216 }
 0x153   :  { %v219_v30 = vmul.f32 %v1172_v26, %v217_v29  ;;  %v1157_v29 = vld [vmem:[%s1585_s2 + $0x8] sm:$0xff]  }
 0x1c3   :  { %v227_v31 = vpop.permute.xlu1 %226 }
 0x1c4   :  { %v229_v32 = vadd.f32 %v227_v31, %v219_v30  ;;  %v1158_v30 = vld [vmem:[%s1585_s2] sm:$0xff]  }
 0x1c6   :  { %1173 = vtanh.f32 %v229_v32 }
 0x1d3   :  { %v1174_v35 = vpop.eup %1173 }
 0x1d4   :  { %232 = vrot.lane.b32.xlu1 %v1174_v35, %s1277_s12 }
 0x246   :  { %v233_v36 = vpop.permute.xlu1 %232 }
 0x247   :  { %v1373_v37 = vmul.f32 %v1172_v26, %v233_v36  ;;  %v116_v36 = vadd.f32 %v1381_v40, %v1358_v13 }
 0x249   :  { %v253_v38 = vpack.c.bf16 %v1373_v37, %v1373_v37 }
 0x24b   :  { %259 = vrot.lane.b32.xlu0 %v253_v38, %s1278_s13 }
 0x2bd   :  { %v260_v39 = vpop.permute.xlu0 %259 }
 0x2be   :  { %1092 = vmatmul.mubr.msk.bf16.vlgmr.msra.gmra.mxu1 %vm27_vm1, %v260_v39 }
 0x2bf   :  { %1107 = vmatprep.mubr.msk.bf16.mxu1 %vm1276_vm2, %v1275_v1  ;;  %1104 = vmatpush3.bf16.msra.mxu1 %v1157_v29 }
 0x2c0   :  { %1105 = vmatprep.subr.bf16.mxu1 %v1275_v1 }
 0x2c3   :  { %1106 = vmatpush3.bf16.msra.mxu1 %v1158_v30 }
 0x2c4   :  { %1119 = vmatprep.subr.bf16.mxu1 %v1275_v1 }
 0x37e   :  { %v310_v43 = vpop.f32.mrf.mxu1 }
 0x37f   :  { %v316_v44 = vadd.f32 %v310_v43, %v108_v42 }
 0x380   :  { %v1093_v45 = vpop.f32.mrf.mxu1 }
 0x381   :  { %1175 = vtanh.f32 %v316_v44  ;;  %v1015_v49 = vmul.f32 -1.442695, %v316_v44 }
 0x382   :  { %v313_v46 = vpop.f32.mrf.mxu1 }
 0x383   :  { %1177 = vpow2.f32 %v1015_v49 }
 0x384   :  { %v1094_v47 = vpop.f32.mrf.mxu1 }
 0x38e   :  { %v1176_v48 = vpop.eup %1175 }
 0x38f   :  { %326 = vrot.lane.b32.xlu1 %v1176_v48, %s1277_s12 }
 0x390   :  { %v1178_v50 = vpop.eup %1177 }
 0x391   :  { %v320_v51 = vadd.f32 1.0, %v1178_v50 }
 0x393   :  { %1179 = vrcp.f32 %v320_v51 }
 0x3a0   :  { %v1180_v52 = vpop.eup %1179 }
 0x3a1   :  { %v324_v55 = vmul.f32 %v1180_v52, %v229_v32 }
 0x401   :  { %v327_v53 = vpop.permute.xlu1 %326 }
 0x402   :  { %v329_v54 = vmul.f32 %v1180_v52, %v327_v53  ;;  %v1159_v53 = vld [vmem:[%s1585_s2 + $0x8] sm:$0xff]  }
 0x404   :  { %331 = vrot.lane.b32.xlu0 %v329_v54, %s1278_s13  ;;  %v1160_v54 = vld [vmem:[%s1585_s2] sm:$0xff]  }
 0x476   :  { %v332_v56 = vpop.permute.xlu0 %331 }
 0x477   :  { %v334_v57 = vadd.f32 %v332_v56, %v324_v55 }
 0x479   :  { %1181 = vtanh.f32 %v334_v57 }
 0x486   :  { %v1182_v3 = vpop.eup %1181 }
 0x487   :  { %337 = vrot.lane.b32.xlu1 %v1182_v3, %s1277_s12 }
 0x4f9   :  { %v338_v4 = vpop.permute.xlu1 %337 }
 0x4fa   :  { %v1411_v5 = vmul.f32 %v1180_v52, %v338_v4 }
 0x4fc   :  { %v354_v6 = vpack.c.bf16 %v1411_v5, %v1411_v5 }
 0x4fe   :  { %360 = vrot.lane.b32.xlu0 %v354_v6, %s1278_s13 }
 0x570   :  { %v361_v7 = vpop.permute.xlu0 %360 }
 0x571   :  { %1100 = vmatmul.mubr.msk.bf16.vlgmr.msra.gmra.mxu0 %vm27_vm1, %v361_v7 }
 0x572   :  { %1115 = vmatprep.mubr.msk.bf16.mxu0 %vm1276_vm2, %v1275_v1  ;;  %1112 = vmatpush3.bf16.msra.mxu0 %v1159_v53 }
 0x573   :  { %1113 = vmatprep.subr.bf16.mxu0 %v1275_v1 }
 0x576   :  { %1114 = vmatpush3.bf16.msra.mxu0 %v1160_v54 }
 0x577   :  { %1127 = vmatprep.subr.bf16.mxu0 %v1275_v1 }
 0x631   :  { %v411_v15 = vpop.f32.mrf.mxu0 }
 0x632   :  { %v417_v16 = vadd.f32 %v411_v15, %v113_v14 }
 0x633   :  { %v1101_v17 = vpop.f32.mrf.mxu0 }
 0x634   :  { %1183 = vtanh.f32 %v417_v16  ;;  %v1019_v21 = vmul.f32 -1.442695, %v417_v16 }
 0x635   :  { %v414_v18 = vpop.f32.mrf.mxu0 }
 0x636   :  { %1185 = vpow2.f32 %v1019_v21 }
 0x637   :  { %v1102_v19 = vpop.f32.mrf.mxu0 }
 0x638   :  { %v1161_v19 = vld [vmem:[%s1585_s2 + $0x8] sm:$0xff]  }
 0x641   :  { %v1184_v20 = vpop.eup %1183 }
 0x642   :  { %427 = vrot.lane.b32.xlu1 %v1184_v20, %s1277_s12  ;;  %v1162_v20 = vld [vmem:[%s1585_s2] sm:$0xff]  }
 0x643   :  { %v1186_v22 = vpop.eup %1185 }
 0x644   :  { %v421_v23 = vadd.f32 1.0, %v1186_v22 }
 0x646   :  { %1187 = vrcp.f32 %v421_v23 }
 0x653   :  { %v1188_v24 = vpop.eup %1187 }
 0x654   :  { %v425_v12 = vmul.f32 %v1188_v24, %v334_v57 }
 0x6b4   :  { %v428_v25 = vpop.permute.xlu1 %427 }
 0x6b5   :  { %v430_v26 = vmul.f32 %v1188_v24, %v428_v25 }
 0x6b7   :  { %432 = vrot.lane.b32.xlu0 %v430_v26, %s1278_s13  ;;  %v124_v26 = vadd.f32 %v1358_v13, %v1425_v11 }
 0x729   :  { %v433_v27 = vpop.permute.xlu0 %432 }
 0x72a   :  { %v435_v28 = vadd.f32 %v433_v27, %v425_v12 }
 0x72c   :  { %1189 = vtanh.f32 %v435_v28 }
 0x739   :  { %v1190_v31 = vpop.eup %1189 }
 0x73a   :  { %438 = vrot.lane.b32.xlu1 %v1190_v31, %s1277_s12 }
 0x7ac   :  { %v439_v32 = vpop.permute.xlu1 %438 }
 0x7ad   :  { %v1440_v33 = vmul.f32 %v1188_v24, %v439_v32 }
 0x7af   :  { %v455_v34 = vpack.c.bf16 %v1440_v33, %v1440_v33 }
 0x7b1   :  { %461 = vrot.lane.b32.xlu0 %v455_v34, %s1278_s13 }
 0x823   :  { %v462_v35 = vpop.permute.xlu0 %461 }
 0x824   :  { %1108 = vmatmul.mubr.msk.bf16.vlgmr.msra.gmra.mxu1 %vm27_vm1, %v462_v35 }
 0x825   :  { %1123 = vmatprep.mubr.msk.bf16.mxu1 %vm1276_vm2, %v1275_v1  ;;  %1120 = vmatpush3.bf16.msra.mxu1 %v1161_v19 }
 0x826   :  { %1121 = vmatprep.subr.bf16.mxu1 %v1275_v1 }
 0x829   :  { %1122 = vmatpush3.bf16.msra.mxu1 %v1162_v20 }
 0x82a   :  { %1135 = vmatprep.subr.bf16.mxu1 %v1275_v1 }
 0x8e4   :  { %v512_v38 = vpop.f32.mrf.mxu1 }
 0x8e5   :  { %v518_v39 = vadd.f32 %v512_v38, %v116_v36 }
 0x8e6   :  { %v1109_v41 = vpop.f32.mrf.mxu1 }
 0x8e7   :  { %1191 = vtanh.f32 %v518_v39  ;;  %v1023_v45 = vmul.f32 -1.442695, %v518_v39 }
 0x8e8   :  { %v515_v42 = vpop.f32.mrf.mxu1 }
 0x8e9   :  { %1193 = vpow2.f32 %v1023_v45 }
 0x8ea   :  { %v1110_v43 = vpop.f32.mrf.mxu1 }
 0x8eb   :  { %v1163_v43 = vld [vmem:[%s1585_s2 + $0x8] sm:$0xff]  }
 0x8f4   :  { %v1192_v44 = vpop.eup %1191 }
 0x8f5   :  { %528 = vrot.lane.b32.xlu1 %v1192_v44, %s1277_s12  ;;  %v1164_v44 = vld [vmem:[%s1585_s2] sm:$0xff]  }
 0x8f6   :  { %v1194_v46 = vpop.eup %1193 }
 0x8f7   :  { %v522_v47 = vadd.f32 1.0, %v1194_v46 }
 0x8f9   :  { %1195 = vrcp.f32 %v522_v47 }
 0x906   :  { %v1196_v48 = vpop.eup %1195 }
 0x907   :  { %v526_v40 = vmul.f32 %v1196_v48, %v435_v28 }
 0x967   :  { %v529_v49 = vpop.permute.xlu1 %528 }
 0x968   :  { %v531_v50 = vmul.f32 %v1196_v48, %v529_v49 }
 0x96a   :  { %533 = vrot.lane.b32.xlu0 %v531_v50, %s1278_s13  ;;  %v129_v50 = vadd.f32 %v1419_v8, %v1358_v13 }
 0x9dc   :  { %v534_v51 = vpop.permute.xlu0 %533 }
 0x9dd   :  { %v536_v52 = vadd.f32 %v534_v51, %v526_v40 }
 0x9df   :  { %1197 = vtanh.f32 %v536_v52 }
 0x9ec   :  { %v1198_v55 = vpop.eup %1197 }
 0x9ed   :  { %539 = vrot.lane.b32.xlu1 %v1198_v55, %s1277_s12 }
 0xa5f   :  { %v540_v56 = vpop.permute.xlu1 %539 }
 0xa60   :  { %v1461_v57 = vmul.f32 %v1196_v48, %v540_v56 }
 0xa62   :  { %v556_v58 = vpack.c.bf16 %v1461_v57, %v1461_v57 }
 0xa64   :  { %562 = vrot.lane.b32.xlu0 %v556_v58, %s1278_s13 }
 0xad6   :  { %v563_v59 = vpop.permute.xlu0 %562 }
 0xad7   :  { %1116 = vmatmul.mubr.msk.bf16.vlgmr.msra.gmra.mxu0 %vm27_vm1, %v563_v59 }
 0xad8   :  { %1131 = vmatprep.mubr.msk.bf16.mxu0 %vm1276_vm2, %v1275_v1  ;;  %1128 = vmatpush3.bf16.msra.mxu0 %v1163_v43 }
 0xad9   :  { %1129 = vmatprep.subr.bf16.mxu0 %v1275_v1 }
 0xadc   :  { %1130 = vmatpush3.bf16.msra.mxu0 %v1164_v44 }
 0xb97   :  { %v613_v61 = vpop.f32.mrf.mxu0 }
 0xb98   :  { %v619_v62 = vadd.f32 %v613_v61, %v121_v60 }
 0xb99   :  { %v1117_v63 = vpop.f32.mrf.mxu0 }
 0xb9a   :  { %1199 = vtanh.f32 %v619_v62  ;;  %v1027_v4 = vmul.f32 -1.442695, %v619_v62 }
 0xb9b   :  { %v616_v0 = vpop.f32.mrf.mxu0 }
 0xb9c   :  { %1201 = vpow2.f32 %v1027_v4 }
 0xb9d   :  { %v1118_v2 = vpop.f32.mrf.mxu0 }
 0xb9e   :  { %v1165_v2 = vld [vmem:[%s1585_s2 + $0x8] sm:$0xff]  }
 0xba7   :  { %v1200_v3 = vpop.eup %1199 }
 0xba8   :  { %629 = vrot.lane.b32.xlu1 %v1200_v3, %s1277_s12  ;;  %v1166_v3 = vld [vmem:[%s1585_s2] sm:$0xff]  }
 0xba9   :  { %v1202_v6 = vpop.eup %1201 }
 0xbaa   :  { %v623_v7 = vadd.f32 1.0, %v1202_v6 }
 0xbac   :  { %1203 = vrcp.f32 %v623_v7 }
 0xbb9   :  { %v1204_v14 = vpop.eup %1203 }
 0xbba   :  { %v627_v9 = vmul.f32 %v1204_v14, %v536_v52 }
 0xc1a   :  { %v630_v15 = vpop.permute.xlu1 %629 }
 0xc1b   :  { %v632_v16 = vmul.f32 %v1204_v14, %v630_v15 }
 0xc1d   :  { %634 = vrot.lane.b32.xlu0 %v632_v16, %s1278_s13  ;;  %v132_v16 = vadd.f32 %v1423_v10, %v1358_v13 }
 0xc8f   :  { %v635_v17 = vpop.permute.xlu0 %634 }
 0xc90   :  { %v637_v18 = vadd.f32 %v635_v17, %v627_v9 }
 0xc92   :  { %1205 = vtanh.f32 %v637_v18 }
 0xc9f   :  { %v1206_v21 = vpop.eup %1205 }
 0xca0   :  { %640 = vrot.lane.b32.xlu1 %v1206_v21, %s1277_s12 }
 0xd12   :  { %v641_v22 = vpop.permute.xlu1 %640 }
 0xd13   :  { %v1482_v23 = vmul.f32 %v1204_v14, %v641_v22 }
 0xd15   :  { %v657_v24 = vpack.c.bf16 %v1482_v23, %v1482_v23 }
 0xd17   :  { %663 = vrot.lane.b32.xlu0 %v657_v24, %s1278_s13 }
 0xd89   :  { %v664_v25 = vpop.permute.xlu0 %663 }
 0xd8a   :  { %1124 = vmatmul.mubr.msk.bf16.vlgmr.msra.gmra.mxu1 %vm27_vm1, %v664_v25 }
 0xd8b   :  { %1139 = vmatprep.mubr.msk.bf16.mxu1 %vm1276_vm2, %v1275_v1  ;;  %1136 = vmatpush3.bf16.msra.mxu1 %v1165_v2 }
 0xd8c   :  { %1137 = vmatprep.subr.bf16.mxu1 %v1275_v1 }
 0xd8f   :  { %1138 = vmatpush3.bf16.msra.mxu1 %v1166_v3 }
 0xe4a   :  { %v714_v12 = vpop.f32.mrf.mxu1 }
 0xe4b   :  { %v720_v27 = vadd.f32 %v714_v12, %v124_v26 }
 0xe4c   :  { %v1125_v28 = vpop.f32.mrf.mxu1 }
 0xe4d   :  { %1207 = vtanh.f32 %v720_v27  ;;  %v1031_v32 = vmul.f32 -1.442695, %v720_v27 }
 0xe4e   :  { %v717_v29 = vpop.f32.mrf.mxu1 }
 0xe4f   :  { %1209 = vpow2.f32 %v1031_v32 }
 0xe50   :  { %v1126_v30 = vpop.f32.mrf.mxu1 }
 0xe5a   :  { %v1208_v31 = vpop.eup %1207 }
 0xe5b   :  { %730 = vrot.lane.b32.xlu1 %v1208_v31, %s1277_s12 }
 0xe5c   :  { %v1210_v34 = vpop.eup %1209 }
 0xe5d   :  { %v724_v35 = vadd.f32 1.0, %v1210_v34 }
 0xe5f   :  { %1211 = vrcp.f32 %v724_v35 }
 0xe6c   :  { %v1212_v36 = vpop.eup %1211 }
 0xe6d   :  { %v728_v11 = vmul.f32 %v1212_v36, %v637_v18 }
 0xecd   :  { %v731_v38 = vpop.permute.xlu1 %730 }
 0xece   :  { %v733_v39 = vmul.f32 %v1212_v36, %v731_v38 }
 0xed0   :  { %735 = vrot.lane.b32.xlu0 %v733_v39, %s1278_s13 }
 0xf42   :  { %v736_v41 = vpop.permute.xlu0 %735 }
 0xf43   :  { %v738_v42 = vadd.f32 %v736_v41, %v728_v11 }
 0xf45   :  { %1213 = vtanh.f32 %v738_v42 }
 0xf52   :  { %v1214_v45 = vpop.eup %1213 }
 0xf53   :  { %741 = vrot.lane.b32.xlu1 %v1214_v45, %s1277_s12 }
 0xfc5   :  { %v742_v46 = vpop.permute.xlu1 %741 }
 0xfc6   :  { %v1502_v47 = vmul.f32 %v1212_v36, %v742_v46 }
 0xfc8   :  { %v758_v48 = vpack.c.bf16 %v1502_v47, %v1502_v47 }
 0xfca   :  { %764 = vrot.lane.b32.xlu0 %v758_v48, %s1278_s13 }
0x103c   :  { %v765_v49 = vpop.permute.xlu0 %764 }
0x103d   :  { %1132 = vmatmul.mubr.msk.bf16.vlgmr.msra.gmra.mxu0 %vm27_vm1, %v765_v49 }
0x10fd   :  { %v815_v40 = vpop.f32.mrf.mxu0 }
0x10fe   :  { %v821_v51 = vadd.f32 %v815_v40, %v129_v50 }
0x10ff   :  { %v1133_v52 = vpop.f32.mrf.mxu0 }
0x1100   :  { %1215 = vtanh.f32 %v821_v51  ;;  %v1035_v56 = vmul.f32 -1.442695, %v821_v51 }
0x1101   :  { %v818_v53 = vpop.f32.mrf.mxu0 }
0x1102   :  { %1217 = vpow2.f32 %v1035_v56 }
0x1103   :  { %v1134_v54 = vpop.f32.mrf.mxu0 }
0x110d   :  { %v1216_v55 = vpop.eup %1215 }
0x110e   :  { %831 = vrot.lane.b32.xlu1 %v1216_v55, %s1277_s12 }
0x110f   :  { %v1218_v58 = vpop.eup %1217 }
0x1110   :  { %v825_v59 = vadd.f32 1.0, %v1218_v58 }
0x1112   :  { %1219 = vrcp.f32 %v825_v59 }
0x111f   :  { %v1220_v60 = vpop.eup %1219 }
0x1120   :  { %v829_v8 = vmul.f32 %v1220_v60, %v738_v42 }
0x1180   :  { %v832_v61 = vpop.permute.xlu1 %831 }
0x1181   :  { %v834_v62 = vmul.f32 %v1220_v60, %v832_v61 }
0x1183   :  { %836 = vrot.lane.b32.xlu0 %v834_v62, %s1278_s13 }
0x11f5   :  { %v837_v63 = vpop.permute.xlu0 %836 }
0x11f6   :  { %v839_v0 = vadd.f32 %v837_v63, %v829_v8 }
0x11f8   :  { %1221 = vtanh.f32 %v839_v0 }
0x1205   :  { %v1222_v4 = vpop.eup %1221 }
0x1206   :  { %842 = vrot.lane.b32.xlu1 %v1222_v4, %s1277_s12 }
0x1278   :  { %v843_v6 = vpop.permute.xlu1 %842 }
0x1279   :  { %v845_v7 = vmul.f32 %v1220_v60, %v843_v6 }
0x127b   :  { %v859_v14 = vpack.c.bf16 %v845_v7, %v845_v7 }
0x127d   :  { %865 = vrot.lane.b32.xlu0 %v859_v14, %s1278_s13 }
0x12ef   :  { %v866_v15 = vpop.permute.xlu0 %865 }
0x12f0   :  { %1140 = vmatmul.mubr.msk.bf16.vlgmr.msra.gmra.mxu1 %vm27_vm1, %v866_v15 }
0x13b0   :  { %v916_v9 = vpop.f32.mrf.mxu1 }
0x13b1   :  { %v922_v17 = vadd.f32 %v916_v9, %v132_v16 }
0x13b2   :  { %v1141_v18 = vpop.f32.mrf.mxu1 }
0x13b3   :  { %1223 = vtanh.f32 %v922_v17  ;;  %v1039_v21 = vmul.f32 -1.442695, %v922_v17 }
0x13b4   :  { %v919_v1 = vpop.f32.mrf.mxu1 }
0x13b5   :  { %1225 = vpow2.f32 %v1039_v21 }
0x13b6   :  { %v1142_v19 = vpop.f32.mrf.mxu1 }
0x13c0   :  { %v1224_v20 = vpop.eup %1223 }
0x13c1   :  { %932 = vrot.lane.b32.xlu1 %v1224_v20, %s1277_s12 }
0x13c2   :  { %v1226_v22 = vpop.eup %1225 }
0x13c3   :  { %v926_v24 = vadd.f32 1.0, %v1226_v22 }
0x13c5   :  { %1227 = vrcp.f32 %v926_v24 }
0x13d2   :  { %v1228_v25 = vpop.eup %1227 }
0x13d3   :  { %v930_v13 = vmul.f32 %v1228_v25, %v839_v0 }
0x1433   :  { %v933_v26 = vpop.permute.xlu1 %932 }
0x1434   :  { %v935_v12 = vmul.f32 %v1228_v25, %v933_v26 }
0x1436   :  { %937 = vrot.lane.b32.xlu0 %v935_v12, %s1278_s13 }
0x143a   :  { %248 = vrot.lane.b32.xlu0 %v1373_v37, %s1278_s13 }
0x143e   :  { %450 = vrot.lane.b32.xlu0 %v1440_v33, %s1278_s13 }
0x1442   :  { %652 = vrot.lane.b32.xlu0 %v1482_v23, %s1278_s13 }
0x14a8   :  { %v938_v10 = vpop.permute.xlu0 %937 }
0x14a9   :  { %v940_v27 = vadd.f32 %v938_v10, %v930_v13 }
0x14ab   :  { %1229 = vtanh.f32 %v940_v27 }
0x14ac   :  { %v249_v28 = vpop.permute.xlu0 %248 }
0x14ad   :  { %251 = vst.msk [vmem:[%s1587_s4] sm:$0xff] %vm27_vm1, %v249_v28 }
0x14b0   :  { %v451_v29 = vpop.permute.xlu0 %450 }
0x14b1   :  { %453 = vst.msk [vmem:[%s1587_s4 + $0x10] sm:$0xff] %vm27_vm1, %v451_v29 }
0x14b4   :  { %v653_v37 = vpop.permute.xlu0 %652 }
0x14b5   :  { %655 = vst.msk [vmem:[%s1587_s4 + $0x20] sm:$0xff] %vm27_vm1, %v653_v37 }
0x14b8   :  { %v1230_v33 = vpop.eup %1229 }
0x14b9   :  { %943 = vrot.lane.b32.xlu1 %v1230_v33, %s1277_s12  ;;  %s1231_s12 = scalar_lea.vmem %s989_s30, 128 }
0x14ba   :  { %p1232_p0 = scmp.ne.s32.totalorder %s989_s30, %s1231_s12  ;;  %p1237_p2 = scmp.lt.s32.totalorder %s1231_s12, %s1231_s12 }
0x14bc   :  { %p1238_p3 = por %p1237_p2, %p1236_p1 }
0x14bd   :  { %961 = vrot.lane.b32.xlu1 %v940_v27, %s1279_s0 }
0x14be   :  { %p1239_p4 = pnand %p1238_p3, %p1232_p0 }
0x14c1   :  { %349 = vrot.lane.b32.xlu1 %v1411_v5, %s1278_s13 }
0x14c5   :  { %551 = vrot.lane.b32.xlu1 %v1461_v57, %s1278_s13 }
0x14c9   :  { %753 = vrot.lane.b32.xlu1 %v1502_v47, %s1278_s13 }
0x152b   :  { %v944_v23 = vpop.permute.xlu1 %943 }
0x152c   :  { %v946_v30 = vmul.f32 %v1228_v25, %v944_v23 }
0x152e   :  { %955 = vrot.lane.b32.xlu0 %v946_v30, %s1278_s13 }
0x152f   :  { %v962_v31 = vpop.permute.xlu1 %961 }
0x1530   :  { %964 = vst.msk [vmem:[#allocation3] sm:$0xff] %vm27_vm1, %v962_v31  ;;  %969 = vst.msk [vmem:[#allocation7] sm:$0xff] %vm27_vm1, %v962_v31 }
0x1531   :  { %1242 = shalt.err (!%p1239_p4)
}
0x1532   :  { %991 = dma.vmem_to_hbm [thread:$0]  %s989_s30, 128, %s1589_s6, [#allocation8]   ;;  %854 = vrot.lane.b32.xlu0 %v845_v7, %s1278_s13 }
0x1533   :  { %v350_v5 = vpop.permute.xlu1 %349  ;;  %s1281_s6 = smov [#allocation5]  }
0x1534   :  { %352 = vst.msk [vmem:[%s1587_s4 + $0x8] sm:$0xff] %vm27_vm1, %v350_v5  ;;  %s978_s13 = sshll.u32 %s1281_s6, 4  ;;  %s979_s13 = int_to_ptr.vmem [resolvable:$true] %s978_s13 }
0x1535   :  { %s1251_s17 = scalar_lea.vmem %s979_s13, 128  ;;  %p1256_p6 = scmp.lt.s32.totalorder %s979_s13, %s979_s13 }
0x1536   :  { %p1252_p5 = scmp.ne.s32.totalorder %s979_s13, %s1251_s17  ;;  %p1257_p7 = scmp.lt.s32.totalorder %s1251_s17, %s1251_s17 }
0x1537   :  { %v552_v57 = vpop.permute.xlu1 %551 }
0x1538   :  { %554 = vst.msk [vmem:[%s1587_s4 + $0x18] sm:$0xff] %vm27_vm1, %v552_v57  ;;  %p1258_p8 = por %p1257_p7, %p1256_p6 }
0x153a   :  { %p1259_p9 = pnand %p1258_p8, %p1252_p5 }
0x153b   :  { %v754_v32 = vpop.permute.xlu1 %753 }
0x153c   :  { %756 = vst.msk [vmem:[%s1587_s4 + $0x28] sm:$0xff] %vm27_vm1, %v754_v32 }
0x15a0   :  { %v956_v34 = vpop.permute.xlu0 %955 }
0x15a1   :  { %958 = vst.msk [vmem:[%s1587_s4 + $0x38] sm:$0xff] %vm27_vm1, %v956_v34  ;;  %959 = vst.msk [vmem:[#allocation2] sm:$0xff] %vm27_vm1, %v956_v34 }
0x15a2   :  { %968 = vst.msk [vmem:[#allocation5] sm:$0xff] %vm27_vm1, %v956_v34 }
0x15a3   :  { %1262 = shalt.err (!%p1259_p9)
}
0x15a4   :  { %981 = dma.vmem_to_hbm [thread:$0]  %s979_s13, 128, %s1588_s5, [#allocation6]   ;;  %v855_v35 = vpop.permute.xlu0 %854 }
0x15a5   :  { %857 = vst.msk [vmem:[%s1587_s4 + $0x30] sm:$0xff] %vm27_vm1, %v855_v35 }
0x15a6   :  { %1271 = dma.done.wait [#allocation6], 128  }
0x15a7   :  { %1272 = vsyncadd [#allocation6], 4294967168 }
0x15a8   :  { %1273 = dma.done.wait [#allocation8], 128  }
0x15a9   :  { %1274 = vsyncadd [#allocation8], 4294967168 }
0x15aa   :  { %1000 = vsyncpa [#allocation6], 1 }
0x15ab   :  { %1001 = vsyncpa [#allocation8], 1 }

</bundles_post_ra>
